<compile_context>
chip_gen: v7x
topology: tpu7x:2x2x1
jax: 0.10.0
libtpu: 0.0.40
codegen_flags: <defaults>
</compile_context>

<pallas_src>
from functools import partial

import jax
import jax.numpy as jnp
from jax.experimental import pallas as pl
from jax.experimental.pallas import tpu as pltpu


# ----------------------------------------------------------------------------
# Tiling helpers
# ----------------------------------------------------------------------------
LANE_TILE = 4096          # lane-tile cap (multiple of 128); review suggested 2048-8192


def _pad_to_multiple(n, m):
    return ((n + m - 1) // m) * m


def _vmem_limit_bytes(working_set_bytes):
    # 2x headroom over the double-buffered working set; never below the 32 MiB default
    # scoped limit, and kept clear of v7x's 64 MiB physical VMEM.
    return int(min(56 * 2 ** 20, max(32 * 2 ** 20, 2 * working_set_bytes)))


# ----------------------------------------------------------------------------
# Pallas kernels
# ----------------------------------------------------------------------------
def _noise_kernel(x_ref, n_ref, sig_ref, o_ref):
    # noised = input + noise * sigma.  Stays in the input dtype (bf16 VPU on v6e/v7x).
    sig = sig_ref[...].astype(x_ref.dtype)
    o_ref[...] = x_ref[...] + n_ref[...] * sig


def _loss_kernel(x_ref, y_ref, out_ref, dx_acc, dy_acc, lc_acc, *,
                 batch, lane_out, loss_type):
    """F-tiled reduction.  grid = (n_cores 'parallel', tiles_per_core 'arbitrary').

    Scratch accumulators persist across the inner ('arbitrary') axis and are
    re-initialized at k == 0 for every core index c, so the kernel is correct both
    when c runs on separate TensorCores (v7x megacore) and sequentially (v5e/v6e).
    """
    k = pl.program_id(1)

    @pl.when(k == 0)
    def _init():
        dx_acc[...] = jnp.zeros_like(dx_acc)
        dy_acc[...] = jnp.zeros_like(dy_acc)
        lc_acc[...] = jnp.zeros_like(lc_acc)

    x = x_ref[...]          # (B, F_tile) model_output tile (elementwise in input dtype)
    y = y_ref[...]          # (B, F_tile) target tile

    diff = x - y
    if loss_type == "l2":
        d32 = diff.astype(jnp.float32)
        lc_acc[...] += jnp.sum(d32 * d32, axis=-1, keepdims=True)                 # (B, 1)
    else:  # "l1"
        lc_acc[...] += jnp.sum(jnp.abs(diff).astype(jnp.float32),
                               axis=-1, keepdims=True)                            # (B, 1)

    # PairwiseL1LossCdist partial sums:  Dx[i, j] += sum_f |x_i - x_j| over this F tile.
    # All B columns are built locally and accumulated with a single (B, B) add per tile
    # (no per-j masked lane-1 RMW stores).
    # TODO(synk): PairwiseL1LossCdist source not provided; assumed semantics:
    #   D_x = cdist(x, x, p=1); D_y = cdist(y, y, p=1); reg[i] = mean_j |D_x[ij]-D_y[ij]|
    # TODO(synk): for B >= 8, exploit D symmetry (upper triangle + mirror at finalize)
    #             and switch to lax.fori_loop(unroll=True) to bound live ranges.
    cols_x, cols_y = [], []
    for j in range(batch):
        cols_x.append(jnp.sum(jnp.abs(x - x[j:j + 1, :]).astype(jnp.float32),
                              axis=-1, keepdims=True))
        cols_y.append(jnp.sum(jnp.abs(y - y[j:j + 1, :]).astype(jnp.float32),
                              axis=-1, keepdims=True))
    dx_acc[...] += jnp.concatenate(cols_x, axis=-1)                               # (B, B)
    dy_acc[...] += jnp.concatenate(cols_y, axis=-1)                               # (B, B)

    @pl.when(k == pl.num_programs(1) - 1)
    def _finalize():
        # Pack raw per-core partials into one lane-dense block, written once:
        #   lanes [0, B)    = Dx rows
        #   lanes [B, 2B)   = Dy rows
        #   lane  2B        = sum(diff^2)  (or sum|diff| for l1)
        parts = [dx_acc[...], dy_acc[...], lc_acc[...]]
        pad_w = lane_out - 2 * batch - 1
        if pad_w > 0:
            parts.append(jnp.zeros((batch, pad_w), jnp.float32))
        out_ref[0] = jnp.concatenate(parts, axis=-1)


# ----------------------------------------------------------------------------
# Pallas wrappers
# ----------------------------------------------------------------------------
def get_noised_input_pallas(input_flat, noise_flat, sigmas):
    """noised_input = input + noise * append_dims(sigmas)."""
    B, F = input_flat.shape
    dt = input_flat.dtype
    itemsize = jnp.dtype(dt).itemsize

    # Fill sublanes at small B: (B, F) -> (B*S, F/S) with sigma repeated per sub-row.
    # Pure elementwise op => the reshape is semantics-free.
    S = next(s for s in (8, 4, 2, 1) if F % s == 0)
    rows, F2 = B * S, F // S
    x = input_flat.reshape(rows, F2)
    n = noise_flat.reshape(rows, F2)
    sig = jnp.repeat(sigmas.astype(jnp.float32), S).reshape(rows, 1)

    f_tile = min(LANE_TILE, _pad_to_multiple(F2, 128))
    Fp = _pad_to_multiple(F2, f_tile)
    if Fp != F2:   # zero-pad lanes; sliced away below
        x = jnp.pad(x, ((0, 0), (0, Fp - F2)))
        n = jnp.pad(n, ((0, 0), (0, Fp - F2)))
    n_tiles = Fp // f_tile

    # TODO(synk): HBM traffic could drop a full stream by generating the Gaussian noise
    # in-kernel (pltpu.prng_seed + prng_random_bits + Box-Muller) or by fusing the
    # denoiser's c_in pre-scale here; both change reproducibility / ownership, so the
    # jax.random noise array is kept as an input.
    working = 4 * 2 * rows * f_tile * itemsize   # (3 in + 1 out) x double buffer

    out = pl.pallas_call(
        _noise_kernel,
        out_shape=jax.ShapeDtypeStruct((rows, Fp), dt),
        grid_spec=pltpu.PrefetchScalarGridSpec(
            num_scalar_prefetch=0,
            grid=(n_tiles,),
            in_specs=[pl.BlockSpec((rows, f_tile), lambda k: (0, k)),
                      pl.BlockSpec((rows, f_tile), lambda k: (0, k)),
                      pl.BlockSpec((rows, 1), lambda k: (0, 0))],
            out_specs=pl.BlockSpec((rows, f_tile), lambda k: (0, k))),
        compiler_params=pltpu.CompilerParams(
            dimension_semantics=("parallel",),
            vmem_limit_bytes=_vmem_limit_bytes(working)),
        cost_estimate=pl.CostEstimate(flops=int(2 * B * F), transcendentals=0,
                                      bytes_accessed=int(3 * B * F * itemsize)),
    )(x, n, sig)

    if Fp != F2:
        out = out[:, :F2]
    return out.reshape(B, F)


def regularized_loss_pallas(model_output, target, w, *, reg_weight, loss_type):
    B = target.shape[0]
    x = model_output.reshape(B, -1)
    y = target.reshape(B, -1)
    F = x.shape[1]
    itemsize = jnp.dtype(x.dtype).itemsize

    # Tile the F (reduction) axis; split it across 2 TensorCores when there are >= 2 tiles.
    F128 = _pad_to_multiple(F, 128)
    f_tile = min(LANE_TILE, F128)
    n_tiles = -(-F128 // f_tile)
    if n_tiles >= 2:
        n_cores = 2                               # v7x megacore split of the F reduction
        n_tiles = _pad_to_multiple(n_tiles, 2)
    else:
        n_cores = 1
    tiles_per_core = n_tiles // n_cores
    Fp = n_tiles * f_tile

    if Fp != F:
        # Identical zero padding of x and y is loss-neutral: diff = 0 and the pairwise
        # |x_i - x_j| / |y_i - y_j| contributions on padded lanes are 0.
        x = jnp.pad(x, ((0, 0), (0, Fp - F)))
        y = jnp.pad(y, ((0, 0), (0, Fp - F)))

    lane_out = max(128, _pad_to_multiple(2 * B + 1, 128))
    kernel = partial(_loss_kernel, batch=B, lane_out=lane_out, loss_type=loss_type)
    working = 2 * 2 * B * f_tile * itemsize       # 2 input streams x double buffer

    out = pl.pallas_call(
        kernel,
        out_shape=jax.ShapeDtypeStruct((n_cores, B, lane_out), jnp.float32),
        grid_spec=pltpu.PrefetchScalarGridSpec(
            num_scalar_prefetch=0,
            grid=(n_cores, tiles_per_core),       # (core split, F reduction — last)
            # TODO(synk): sweep pipeline_mode=pl.Buffered(3) on x/y if profiling still
            # shows exposed DMA after the larger tiles.
            in_specs=[pl.BlockSpec((B, f_tile),
                                   lambda c, k: (0, c * tiles_per_core + k)),
                      pl.BlockSpec((B, f_tile),
                                   lambda c, k: (0, c * tiles_per_core + k))],
            out_specs=pl.BlockSpec((1, B, lane_out), lambda c, k: (c, 0, 0)),
            scratch_shapes=[pltpu.VMEM((B, B), jnp.float32),   # Dx accumulator
                            pltpu.VMEM((B, B), jnp.float32),   # Dy accumulator
                            pltpu.VMEM((B, 1), jnp.float32)]), # sum(diff^2) accumulator
        compiler_params=pltpu.CompilerParams(
            dimension_semantics=("parallel", "arbitrary"),
            vmem_limit_bytes=_vmem_limit_bytes(working)),
        cost_estimate=pl.CostEstimate(flops=int((4 * B * B + 3 * B) * F),
                                      transcendentals=0,
                                      bytes_accessed=int(2 * B * Fp * itemsize)),
    )(x, y)

    # Tiny (B,)-sized epilogue in plain JAX: combine per-core partials and apply
    # w, 1/F, 1/B and regularization_weight (hoisted out of the kernel entirely).
    dx = jnp.sum(out[:, :, 0:B], axis=0)                       # (B, B)
    dy = jnp.sum(out[:, :, B:2 * B], axis=0)                   # (B, B)
    lc = jnp.sum(out[:, :, 2 * B], axis=0)                     # (B,)

    w_flat = w.reshape(B).astype(jnp.float32)
    loss_comp = w_flat * (lc / float(F))                       # mean(w*diff^2) == w*mean(diff^2)
    reg = jnp.sum(jnp.abs(dx - dy), axis=-1) / float(B)        # mean_j |Dx - Dy|
    reg_loss = w_flat * reg
    loss = loss_comp + reg_loss * float(reg_weight)
    return {loss_type: loss_comp, "reg_loss": reg_loss, "loss": loss}


# ----------------------------------------------------------------------------
# Module (JAX port).  Parameters / samplers are deterministic, EDM-style defaults.
# ----------------------------------------------------------------------------
class StandardRegularizedDiffusionLoss:
    def __init__(self, loss_type="l2", offset_noise_level=0.0,
                 regularization_weight=1.0, p_mean=-1.2, p_std=1.2, sigma_data=0.5):
        assert loss_type in ("l2", "l1")   # lpips raises NotImplementedError upstream
        self.loss_type = loss_type
        self.offset_noise_level = offset_noise_level
        self.regularization_weight = regularization_weight
        self.p_mean, self.p_std, self.sigma_data = p_mean, p_std, sigma_data

    # TODO(synk): sigma_sampler comes from a config; EDM log-normal sampler used here.
    def sigma_sampler(self, key, n):
        return jnp.exp(self.p_mean + self.p_std * jax.random.normal(key, (n,), jnp.float32))

    # TODO(synk): loss_weighting comes from a config; EDM weighting used here.
    def loss_weighting(self, sigmas):
        sd = self.sigma_data
        return (sigmas ** 2 + sd ** 2) / (sigmas * sd) ** 2

    def __call__(self, network, denoiser, conditioner, input_nchw, batch, key):
        cond = conditioner(batch)
        k_sig, k_noise = jax.random.split(key)
        B = input_nchw.shape[0]
        F = int(input_nchw.size // B)

        sigmas = self.sigma_sampler(k_sig, B)                        # (B,)
        noise = jax.random.normal(k_noise, input_nchw.shape, input_nchw.dtype)
        # offset_noise_level == 0.0 -> no offset-noise branch (matches default)

        # Pallas: noised_input = input + noise * append_dims(sigmas, ndim)
        noised_flat = get_noised_input_pallas(
            input_nchw.reshape(B, F), noise.reshape(B, F), sigmas)
        noised_input = noised_flat.reshape(input_nchw.shape)

        # TODO(synk): network / denoiser / conditioner are external injected nn.Modules,
        # not owned by this loss; stubbed deterministically in plain JAX below.
        model_output = denoiser(network, noised_input, sigmas, cond)

        w = self.loss_weighting(sigmas)                              # (B,)
        return regularized_loss_pallas(
            model_output, input_nchw, w,
            reg_weight=self.regularization_weight, loss_type=self.loss_type)


# ----------------------------------------------------------------------------
# Deterministic stubs for the external modules
# ----------------------------------------------------------------------------
def make_network(C, key):
    # 1x1-conv channel mixer with deterministic weights (stand-in for the UNet).
    w = 0.02 * jax.random.normal(key, (C, C), jnp.float32)

    def network(x_nchw, c_noise, cond):
        y = jnp.einsum("bchw,cd->bdhw", x_nchw, w)
        return jnp.tanh(y + cond["scale"][:, None, None, None] + c_noise[:, None, None, None])
    return network


def make_denoiser(sigma_data=0.5):
    # EDM preconditioning denoiser.
    def denoiser(network, noised, sigmas, cond):
        s = sigmas[:, None, None, None]
        c_skip = sigma_data ** 2 / (s ** 2 + sigma_data ** 2)
        c_out = s * sigma_data / jnp.sqrt(s ** 2 + sigma_data ** 2)
        c_in = 1.0 / jnp.sqrt(s ** 2 + sigma_data ** 2)
        c_noise = 0.25 * jnp.log(sigmas)
        return c_skip * noised + c_out * network(c_in * noised, c_noise, cond)
    return denoiser


def conditioner(batch):
    return {"scale": batch["cond_scale"]}


# ----------------------------------------------------------------------------
# Pure-JAX reference (for correctness check of the Pallas loss path)
# ----------------------------------------------------------------------------
def reference_loss(model_output, target, w, reg_weight, loss_type):
    B = target.shape[0]
    x = model_output.reshape(B, -1).astype(jnp.float32)
    y = target.reshape(B, -1).astype(jnp.float32)
    wb = w.reshape(B, 1).astype(jnp.float32)
    diff = x - y
    if loss_type == "l2":
        comp = jnp.mean(wb * diff ** 2, axis=1)
    else:
        comp = jnp.mean(wb * jnp.abs(diff), axis=1)
    dx = jnp.sum(jnp.abs(x[:, None, :] - x[None, :, :]), axis=-1)
    dy = jnp.sum(jnp.abs(y[:, None, :] - y[None, :, :]), axis=-1)
    reg = jnp.mean(jnp.abs(dx - dy), axis=1) * w.reshape(B)
    return {loss_type: comp, "reg_loss": reg, "loss": comp + reg * reg_weight}


# ----------------------------------------------------------------------------
if __name__ == "__main__":
    key = jax.random.PRNGKey(0)
    k_in, k_net, k_cond, k_fwd = jax.random.split(key, 4)

    B, C, H, W = 2, 4, 16, 16
    x = jax.random.normal(k_in, (B, C, H, W), jnp.float32)          # NCHW input
    batch = {"cond_scale": 0.1 * jax.random.normal(k_cond, (B,), jnp.float32)}

    loss_module = StandardRegularizedDiffusionLoss(
        loss_type="l2", offset_noise_level=0.0, regularization_weight=1.0)
    network = make_network(C, k_net)
    denoiser = make_denoiser(sigma_data=loss_module.sigma_data)

    loss_dict = loss_module(network, denoiser, conditioner, x, batch, k_fwd)
    jax.tree_util.tree_map(jax.block_until_ready, loss_dict)

    # Cross-check the Pallas path against a pure-JAX reference
    # (recompute the same sigmas / noise / model_output path).
    k_sig, k_noise = jax.random.split(k_fwd)
    sigmas = loss_module.sigma_sampler(k_sig, B)
    noise = jax.random.normal(k_noise, x.shape, x.dtype)
    noised = x + noise * sigmas[:, None, None, None]
    model_output = denoiser(network, noised, sigmas, conditioner(batch))
    w = loss_module.loss_weighting(sigmas)
    ref = reference_loss(model_output, x, w, 1.0, "l2")

    for name in ("l2", "reg_loss", "loss"):
        assert jnp.allclose(loss_dict[name], ref[name], rtol=1e-4, atol=1e-4), name

    print("KERNEL_OK")
</pallas_src>

<mosaic_0001>
module attributes {stable_mosaic.version = 11 : i64} {
  func.func @_noise_kernel(%arg0: i32, %arg1: memref<16x128xf32, #tpu.memory_space<vmem>>, %arg2: memref<16x128xf32, #tpu.memory_space<vmem>>, %arg3: memref<16x1xf32, #tpu.memory_space<vmem>>, %arg4: memref<16x128xf32, #tpu.memory_space<vmem>>) attributes {dimension_semantics = [#tpu.dimension_semantics<parallel>], iteration_bounds = array<i64: 1>, scalar_prefetch = 0 : i64, scratch_operands = 0 : i64, tpu.core_type = #tpu.core_type<tc>, window_params = [{transform_indices = @transform_0, window_bounds = array<i64: 16, 128>}, {transform_indices = @transform_1, window_bounds = array<i64: 16, 128>}, {pipeline_mode = #tpu.pipeline_mode<synchronous>, transform_indices = @transform_2, window_bounds = array<i64: 16, 1>}, {transform_indices = @transform_3, window_bounds = array<i64: 16, 128>}]} {
    %c0 = arith.constant 0 : index
    %c0_0 = arith.constant 0 : index
    %0 = vector.load %arg3[%c0, %c0_0] : memref<16x1xf32, #tpu.memory_space<vmem>>, vector<16x1xf32>
    %c0_1 = arith.constant 0 : index
    %c0_2 = arith.constant 0 : index
    %1 = vector.load %arg1[%c0_1, %c0_2] : memref<16x128xf32, #tpu.memory_space<vmem>>, vector<16x128xf32>
    %c0_3 = arith.constant 0 : index
    %c0_4 = arith.constant 0 : index
    %2 = vector.load %arg2[%c0_3, %c0_4] : memref<16x128xf32, #tpu.memory_space<vmem>>, vector<16x128xf32>
    %3 = vector.broadcast %0 : vector<16x1xf32> to vector<16x128xf32>
    %4 = arith.mulf %2, %3 : vector<16x128xf32>
    %5 = arith.addf %1, %4 : vector<16x128xf32>
    %c0_5 = arith.constant 0 : index
    %c0_6 = arith.constant 0 : index
    %6 = vector.load %arg4[%c0_5, %c0_6] : memref<16x128xf32, #tpu.memory_space<vmem>>, vector<16x128xf32>
    tpu.vector_store %arg4[%c0_5, %c0_6], %5 {strides = array<i32>} : memref<16x128xf32, #tpu.memory_space<vmem>>, vector<16x128xf32>,
    return
  }
  func.func @transform_0(%arg0: i32) -> (i32, i32) {
    %c0_i32 = arith.constant 0 : i32
    %c0_i32_0 = arith.constant 0 : i32
    return %c0_i32, %arg0 : i32, i32
  }
  func.func @transform_1(%arg0: i32) -> (i32, i32) {
    %c0_i32 = arith.constant 0 : i32
    %c0_i32_0 = arith.constant 0 : i32
    return %c0_i32, %arg0 : i32, i32
  }
  func.func @transform_2(%arg0: i32) -> (i32, i32) {
    %c0_i32 = arith.constant 0 : i32
    %c0_i32_0 = arith.constant 0 : i32
    %c0_i32_1 = arith.constant 0 : i32
    return %c0_i32, %c0_i32_0 : i32, i32
  }
  func.func @transform_3(%arg0: i32) -> (i32, i32) {
    %c0_i32 = arith.constant 0 : i32
    %c0_i32_0 = arith.constant 0 : i32
    return %c0_i32, %arg0 : i32, i32
  }
}

</mosaic_0001>

<bundles_post_ra>
// kernel: tpu_custom_call.1
= control target key start
LH: loop header
LB: loop body
LE: loop exit
PB: predicated region body
PF: predicated region fallthrough
CT: control target
= control target key end

     0   :  { %8 = vsyncpa [#allocation3], 0  ;;  %s189_s0 = inlined_call_operand.vmem [shape: f32[16,128], index: 0, kind: input, shape index: {}]   ;;  %s190_s1 = inlined_call_operand.hbm [shape: f32[16,128], index: 1, kind: input, shape index: {}]   ;;  %s191_s2 = inlined_call_operand.vmem [shape: f32[16,1], index: 2, kind: input, shape index: {}]   ;;  %s192_s3 = inlined_call_operand.hbm [shape: f32[16,128], index: 3, kind: output, shape index: {}]  }
   0x1   :  { %9 = vsyncpa [#allocation4], 0  ;;  %s122_s12 = smov [#allocation2]   ;;  %s74_s16 = scalar_lea.hbm %s190_s1, 256 }
   0x2   :  { %s17_s13 = sshll.u32 %s122_s12, 4  ;;  %p75_p0 = scmp.ne.s32.totalorder %s190_s1, %s74_s16  ;;  %s18_s13 = int_to_ptr.vmem [resolvable:$true] %s17_s13 }
   0x3   :  { %p78_p1 = scmp.lt.u32.totalorder %s74_s16, %s190_s1 }
   0x5   :  { %p80_p2 = pnand %p78_p1, %p75_p0 }
   0x7   :  { %83 = shalt.err (!%p80_p2)
}
   0x8   :  { %s84_s21 = scalar_lea.vmem %s18_s13, 256  ;;  %p89_p4 = scmp.lt.s32.totalorder %s18_s13, %s18_s13 }
   0x9   :  { %p85_p3 = scmp.ne.s32.totalorder %s18_s13, %s84_s21  ;;  %p90_p5 = scmp.lt.s32.totalorder %s84_s21, %s84_s21 }
   0xb   :  { %p91_p6 = por %p90_p5, %p89_p4 }
   0xd   :  { %p92_p7 = pnand %p91_p6, %p85_p3 }
   0xf   :  { %95 = shalt.err (!%p92_p7)
}
  0x10   :  { %s123_s22 = smov 128   ;;  %s124_s23 = smov 8  }
  0x11   :  { %23 = dma.hbm_to_vmem [thread:$0]  %s190_s1, 256, %s18_s13, [#allocation3], %s123_s22, %s123_s22, %s124_s23  }
  0x12   :  { %118 = dma.done.wait [#allocation3], 256  }
  0x13   :  { %119 = vsyncadd [#allocation3], 4294967040  ;;  %v125_v0 = vmov 0   ;;  %v29_v1 = vld [vmem:[%s191_s2] sm:$0xff]  ;;  %v30_v2 = vld [vmem:[%s191_s2 + $0x8] sm:$0xff]  ;;  %s126_s6 = smov [#allocation5]  }
  0x14   :  { %73 = vset.pattern.permute.xlu0 %v125_v0  ;;  %v33_v3 = vld [vmem:[#allocation2] sm:$0xff]  ;;  %v34_v7 = vld [vmem:[#allocation2 + $0x8] sm:$0xff]  ;;  %s56_s7 = sshll.u32 %s126_s6, 4  ;;  %s57_s7 = int_to_ptr.vmem [resolvable:$true] %s56_s7 }
  0x15   :  { %37 = vperm.xlu0 %73, %v29_v1   ;;  %v31_v4 = vld [vmem:[%s189_s0] sm:$0xff]  ;;  %v32_v9 = vld [vmem:[%s189_s0 + $0x8] sm:$0xff]  ;;  %s96_s2 = scalar_lea.vmem %s57_s7, 256  ;;  %p101_p9 = scmp.lt.s32.totalorder %s57_s7, %s57_s7 }
  0x16   :  { %p97_p8 = scmp.ne.s32.totalorder %s57_s7, %s96_s2  ;;  %p102_p10 = scmp.lt.s32.totalorder %s96_s2, %s96_s2 }
  0x18   :  { %p103_p11 = por %p102_p10, %p101_p9 }
  0x19   :  { %42 = vperm.xlu0 %73, %v30_v2  }
  0x1a   :  { %p104_p12 = pnand %p103_p11, %p97_p8 }
  0x94   :  { %v38_v5 = vpop.permute.xlu0 %37 }
  0x95   :  { %v45_v6 = vmul.f32 %v38_v5, %v33_v3 }
  0x97   :  { %v47_v8 = vadd.f32 %v45_v6, %v31_v4 }
  0x98   :  { %v43_v10 = vpop.permute.xlu0 %42 }
  0x99   :  { %49 = vst [vmem:[#allocation5] sm:$0xff] %v47_v8  ;;  %v46_v11 = vmul.f32 %v43_v10, %v34_v7 }
  0x9b   :  { %v48_v12 = vadd.f32 %v46_v11, %v32_v9 }
  0x9d   :  { %50 = vst [vmem:[#allocation5 + $0x8] sm:$0xff] %v48_v12 }
  0x9e   :  { %107 = shalt.err (!%p104_p12)
}
  0x9f   :  { %s108_s10 = scalar_lea.hbm %s192_s3, 256 }
  0xa0   :  { %p109_p13 = scmp.ne.s32.totalorder %s192_s3, %s108_s10  ;;  %p112_p0 = scmp.lt.u32.totalorder %s108_s10, %s192_s3 }
  0xa2   :  { %p114_p1 = pnand %p112_p0, %p109_p13 }
  0xa4   :  { %117 = shalt.err (!%p114_p1)
}
  0xa5   :  { %62 = dma.vmem_to_hbm [thread:$0]  %s57_s7, 256, %s192_s3, [#allocation4], %s123_s22, %s123_s22, %s124_s23  }
  0xa6   :  { %120 = dma.done.wait [#allocation4], 256  }
  0xa7   :  { %121 = vsyncadd [#allocation4], 4294967040 }
  0xa8   :  { %66 = vsyncpa [#allocation3], 1 }
  0xa9   :  { %67 = vsyncpa [#allocation4], 1 }

</bundles_post_ra>
